<compile_context>
chip_gen: v5e
topology: v5e:2x2
jax: 0.10.0
libtpu: 0.0.40
codegen_flags: <defaults>
</compile_context>

<pallas_src>
import jax
import jax.numpy as jnp
from jax.experimental import pallas as pl
from jax.experimental.pallas import tpu as pltpu

LANE = 128


def _round_up(n, m):
    return ((n + m - 1) // m) * m


def mine_kernel(x_ref, w1_ref, b1_ref, w2_ref, b2_ref, w3_ref, b3_ref, o_ref):
    x = x_ref[...]                                                   # (tb, d_in)
    # Layer 1: Linear + ReLU.  MXU matmul (bf16 or f32 operands), f32 accum.
    h1 = jnp.dot(x, w1_ref[...], preferred_element_type=jnp.float32)
    h1 = jnp.maximum(h1 + b1_ref[...], 0.0)                          # (tb, Hp) f32
    # Layer 2: Linear + ReLU.  Cast back to the MXU operand dtype (no-op in f32).
    h1 = h1.astype(w2_ref.dtype)
    h2 = jnp.dot(h1, w2_ref[...], preferred_element_type=jnp.float32)
    h2 = jnp.maximum(h2 + b2_ref[...], 0.0)                          # (tb, Hp) f32
    # Layer 3: output width 1 -> VPU multiply + lane (XLU) reduction instead of
    # burning an MXU pass on a 1-column result.  b3 comes from SMEM.
    o = jnp.sum(h2 * w3_ref[...], axis=-1, keepdims=True) + b3_ref[0]  # (tb, 1)
    # Lane-dense store: (tb, 1) -> (tb // 128, 128) slab of this tile's output.
    o_ref[...] = o.reshape(o_ref.shape).astype(o_ref.dtype)


def _choose_tile_b(B, tile_b):
    """Tile size: multiple of 128 (lane-dense out / sublane rule), sized to keep
    the padded tail small, split in two when possible so v7x's 2 TCs both run."""
    tile_b = max(LANE, _round_up(tile_b, LANE))
    if B <= tile_b:
        if B > 2 * LANE:
            tile_b = _round_up(pl.cdiv(B, 2), LANE)     # >= 2 grid steps for v7x
        else:
            tile_b = _round_up(B, LANE)
    else:
        n_tiles = pl.cdiv(B, tile_b)
        tile_b = _round_up(pl.cdiv(B, n_tiles), LANE)   # balanced tiles, small tail
    return tile_b


def mine_forward(x, params, *, tile_b=2048, use_bf16=True):
    """x: (B, input_size) f32.  params: dict w1,b1,w2,b2,w3,b3 in (in, out) layout."""
    B, d_in = x.shape
    h = params["w1"].shape[1]
    h_pad = _round_up(h, LANE)
    mxu_dtype = jnp.bfloat16 if use_bf16 else jnp.float32

    # --- pad hidden to 128 lanes.  Downstream padded weight rows are zero, so
    #     padded h1/h2 columns cannot contribute to the output. ----------------
    w1 = jnp.pad(params["w1"], ((0, 0), (0, h_pad - h))).astype(mxu_dtype)
    b1 = jnp.pad(params["b1"].reshape(1, h), ((0, 0), (0, h_pad - h))).astype(jnp.float32)
    w2 = jnp.pad(params["w2"], ((0, h_pad - h), (0, h_pad - h))).astype(mxu_dtype)
    b2 = jnp.pad(params["b2"].reshape(1, h), ((0, 0), (0, h_pad - h))).astype(jnp.float32)
    w3 = jnp.pad(params["w3"].reshape(h, 1),
                 ((0, h_pad - h), (0, 0))).T.astype(jnp.float32)      # (1, Hp) row
    b3 = params["b3"].reshape(1).astype(jnp.float32)                  # SMEM scalar

    # --- batch tiling for pipelining ------------------------------------------
    tile_b = _choose_tile_b(B, tile_b)
    b_pad = _round_up(B, tile_b)
    x = x.astype(mxu_dtype)
    if b_pad != B:
        x = jnp.pad(x, ((0, b_pad - B), (0, 0)))
    n_tiles = b_pad // tile_b
    rows = tile_b // LANE          # lane-dense output rows per batch tile

    # VMEM per step (tile_b=2048, bf16): x 2*(2048*128 lanes*2B) = 1 MiB,
    # out 2*(16*128*4B) = 16 KiB, weights ~72 KiB -> far below every
    # generation's scoped default, so no vmem_limit_bytes override needed.
    flops = 2 * b_pad * (d_in * h_pad + h_pad * h_pad + h_pad)
    bytes_accessed = (x.dtype.itemsize * b_pad * d_in            # x read
                      + 4 * b_pad                                 # out write
                      + w1.size * w1.dtype.itemsize
                      + w2.size * w2.dtype.itemsize
                      + 4 * (3 * h_pad + 1))                      # b1,b2,w3,b3

    out = pl.pallas_call(
        mine_kernel,
        out_shape=jax.ShapeDtypeStruct((n_tiles, rows, LANE), jnp.float32),
        grid=(n_tiles,),
        in_specs=[
            pl.BlockSpec((tile_b, d_in), lambda i: (i, 0)),     # x: batch-tiled
            pl.BlockSpec((d_in, h_pad), lambda i: (0, 0)),      # w1: VMEM-resident
            pl.BlockSpec((1, h_pad), lambda i: (0, 0)),         # b1
            pl.BlockSpec((h_pad, h_pad), lambda i: (0, 0)),     # w2
            pl.BlockSpec((1, h_pad), lambda i: (0, 0)),         # b2
            pl.BlockSpec((1, h_pad), lambda i: (0, 0)),         # w3 row
            pl.BlockSpec(memory_space=pltpu.MemorySpace.SMEM),  # b3 scalar
        ],
        # Lane-dense output slab; leading (tile) dim squeezed out of the kernel.
        out_specs=pl.BlockSpec((None, rows, LANE), lambda i: (i, 0, 0)),
        compiler_params=pltpu.CompilerParams(
            dimension_semantics=("parallel",)),
        cost_estimate=pl.CostEstimate(
            flops=flops, transcendentals=0, bytes_accessed=bytes_accessed),
    )(x, w1, b1, w2, b2, w3, b3)

    # (n_tiles, rows, 128) is just the (b_pad, 1) result re-chunked contiguously.
    return out.reshape(b_pad, 1)[:B]


def init_params(key, input_size, hidden_size):
    """Deterministic init mirroring the PyTorch module:
    weights ~ Normal(0, 0.02), biases = 0.  Weights stored (in, out)."""
    k1, k2, k3 = jax.random.split(key, 3)
    std = 0.02
    return {
        "w1": std * jax.random.normal(k1, (input_size, hidden_size), jnp.float32),
        "b1": jnp.zeros((1, hidden_size), jnp.float32),
        "w2": std * jax.random.normal(k2, (hidden_size, hidden_size), jnp.float32),
        "b2": jnp.zeros((1, hidden_size), jnp.float32),
        "w3": std * jax.random.normal(k3, (hidden_size, 1), jnp.float32),
        "b3": jnp.zeros((1, 1), jnp.float32),
    }


def reference_forward(x, params):
    h1 = jnp.maximum(x @ params["w1"] + params["b1"], 0.0)
    h2 = jnp.maximum(h1 @ params["w2"] + params["b2"], 0.0)
    return h2 @ params["w3"] + params["b3"]


if __name__ == "__main__":
    key = jax.random.PRNGKey(0)
    kx, kp = jax.random.split(key)

    batch = 300         # not a multiple of 128 -> exercises batch padding
    input_size = 16     # MINE takes concatenated (x, y) samples
    hidden_size = 32    # small stand-in for the default 100 (padded to 128)

    x = jax.random.normal(kx, (batch, input_size), jnp.float32)
    params = init_params(kp, input_size, hidden_size)
    ref = reference_forward(x, params)

    # tile_b=128 at this size gives grid=(3,), exercising the multi-step
    # pipelined path; real workloads use the default tile_b=2048.
    # 1) f32 path: bit-faithful to the PyTorch module, checked tight.
    out_f32 = jax.block_until_ready(
        mine_forward(x, params, tile_b=128, use_bf16=False))
    assert out_f32.shape == (batch, 1)
    assert jnp.allclose(out_f32, ref, atol=1e-5, rtol=1e-5)

    # 2) bf16-MXU perf path (default): f32 accumulation, looser tolerance.
    out_bf16 = jax.block_until_ready(
        mine_forward(x, params, tile_b=128, use_bf16=True))
    assert out_bf16.shape == (batch, 1)
    assert jnp.allclose(out_bf16, ref, atol=1e-3, rtol=5e-2)

    print("KERNEL_OK")
</pallas_src>

<mosaic_0001>
module attributes {stable_mosaic.version = 11 : i64} {
  func.func @mine_kernel(%arg0: i32, %arg1: memref<128x16xf32, #tpu.memory_space<vmem>>, %arg2: memref<16x128xf32, #tpu.memory_space<vmem>>, %arg3: memref<1x128xf32, #tpu.memory_space<vmem>>, %arg4: memref<128x128xf32, #tpu.memory_space<vmem>>, %arg5: memref<1x128xf32, #tpu.memory_space<vmem>>, %arg6: memref<1x128xf32, #tpu.memory_space<vmem>>, %arg7: memref<1xf32, #tpu.memory_space<smem>>, %arg8: memref<1x1x128xf32, #tpu.memory_space<vmem>>) attributes {dimension_semantics = [#tpu.dimension_semantics<parallel>], iteration_bounds = array<i64: 3>, scalar_prefetch = 0 : i64, scratch_operands = 0 : i64, tpu.core_type = #tpu.core_type<tc>, window_params = [{transform_indices = @transform_0, window_bounds = array<i64: 128, 16>}, {pipeline_mode = #tpu.pipeline_mode<synchronous>, transform_indices = @transform_1, window_bounds = array<i64: 16, 128>}, {pipeline_mode = #tpu.pipeline_mode<synchronous>, transform_indices = @transform_2, window_bounds = array<i64: 1, 128>}, {pipeline_mode = #tpu.pipeline_mode<synchronous>, transform_indices = @transform_3, window_bounds = array<i64: 128, 128>}, {pipeline_mode = #tpu.pipeline_mode<synchronous>, transform_indices = @transform_4, window_bounds = array<i64: 1, 128>}, {pipeline_mode = #tpu.pipeline_mode<synchronous>, transform_indices = @transform_5, window_bounds = array<i64: 1, 128>}, {transform_indices = @transform_6, window_bounds = array<i64: 1>}, {transform_indices = @transform_7, window_bounds = array<i64: 1, 1, 128>}]} {
    %c0 = arith.constant 0 : index
    %c0_0 = arith.constant 0 : index
    %0 = vector.load %arg1[%c0, %c0_0] : memref<128x16xf32, #tpu.memory_space<vmem>>, vector<128x16xf32>
    %c0_1 = arith.constant 0 : index
    %c0_2 = arith.constant 0 : index
    %1 = vector.load %arg2[%c0_1, %c0_2] : memref<16x128xf32, #tpu.memory_space<vmem>>, vector<16x128xf32>
    %cst = arith.constant dense<0.000000e+00> : vector<128x128xf32>
    %2 = tpu.matmul %0, %1, %cst {dimension_numbers = #tpu.dot_dimension_numbers<[1], [0], [0], [1], [0, 0, 1, 1], [], []>} : vector<128x16xf32>, vector<16x128xf32>, vector<128x128xf32> -> vector<128x128xf32>
    %c0_3 = arith.constant 0 : index
    %c0_4 = arith.constant 0 : index
    %3 = vector.load %arg3[%c0_3, %c0_4] : memref<1x128xf32, #tpu.memory_space<vmem>>, vector<1x128xf32>
    %4 = vector.broadcast %3 : vector<1x128xf32> to vector<128x128xf32>
    %5 = arith.addf %2, %4 : vector<128x128xf32>
    %cst_5 = arith.constant 0.000000e+00 : f32
    %6 = vector.broadcast %cst_5 : f32 to vector<128x128xf32>
    %7 = arith.maximumf %5, %6 : vector<128x128xf32>
    %c0_6 = arith.constant 0 : index
    %c0_7 = arith.constant 0 : index
    %8 = vector.load %arg4[%c0_6, %c0_7] : memref<128x128xf32, #tpu.memory_space<vmem>>, vector<128x128xf32>
    %cst_8 = arith.constant dense<0.000000e+00> : vector<128x128xf32>
    %9 = tpu.matmul %7, %8, %cst_8 {dimension_numbers = #tpu.dot_dimension_numbers<[1], [0], [0], [1], [0, 0, 1, 1], [], []>} : vector<128x128xf32>, vector<128x128xf32>, vector<128x128xf32> -> vector<128x128xf32>
    %c0_9 = arith.constant 0 : index
    %c0_10 = arith.constant 0 : index
    %10 = vector.load %arg5[%c0_9, %c0_10] : memref<1x128xf32, #tpu.memory_space<vmem>>, vector<1x128xf32>
    %11 = vector.broadcast %10 : vector<1x128xf32> to vector<128x128xf32>
    %12 = arith.addf %9, %11 : vector<128x128xf32>
    %cst_11 = arith.constant 0.000000e+00 : f32
    %13 = vector.broadcast %cst_11 : f32 to vector<128x128xf32>
    %14 = arith.maximumf %12, %13 : vector<128x128xf32>
    %c0_12 = arith.constant 0 : index
    %c0_13 = arith.constant 0 : index
    %15 = vector.load %arg6[%c0_12, %c0_13] : memref<1x128xf32, #tpu.memory_space<vmem>>, vector<1x128xf32>
    %16 = vector.broadcast %15 : vector<1x128xf32> to vector<128x128xf32>
    %17 = arith.mulf %14, %16 : vector<128x128xf32>
    %cst_14 = arith.constant dense<0.000000e+00> : vector<128xf32>
    %18 = vector.multi_reduction <add>, %17, %cst_14 [1] : vector<128x128xf32> to vector<128xf32>
    %19 = vector.shape_cast %18 : vector<128xf32> to vector<128x1xf32>
    %c0_15 = arith.constant 0 : index
    %20 = memref.load %arg7[%c0_15] : memref<1xf32, #tpu.memory_space<smem>>
    %21 = vector.broadcast %20 : f32 to vector<128x1xf32>
    %22 = arith.addf %19, %21 : vector<128x1xf32>
    %23 = vector.shape_cast %22 : vector<128x1xf32> to vector<1x128xf32>
    %c0_16 = arith.constant 0 : index
    %c0_17 = arith.constant 0 : index
    %c0_18 = arith.constant 0 : index
    %24 = vector.load %arg8[%c0_16, %c0_17, %c0_18] : memref<1x1x128xf32, #tpu.memory_space<vmem>>, vector<1x1x128xf32>
    %25 = vector.shape_cast %24 : vector<1x1x128xf32> to vector<1x128xf32>
    %26 = vector.shape_cast %23 : vector<1x128xf32> to vector<1x1x128xf32>
    tpu.vector_store %arg8[%c0_16, %c0_17, %c0_18], %26 {strides = array<i32>} : memref<1x1x128xf32, #tpu.memory_space<vmem>>, vector<1x1x128xf32>,
    return
  }
  func.func @transform_0(%arg0: i32) -> (i32, i32) {
    %c0_i32 = arith.constant 0 : i32
    %c0_i32_0 = arith.constant 0 : i32
    return %arg0, %c0_i32 : i32, i32
  }
  func.func @transform_1(%arg0: i32) -> (i32, i32) {
    %c0_i32 = arith.constant 0 : i32
    %c0_i32_0 = arith.constant 0 : i32
    %c0_i32_1 = arith.constant 0 : i32
    return %c0_i32, %c0_i32_0 : i32, i32
  }
  func.func @transform_2(%arg0: i32) -> (i32, i32) {
    %c0_i32 = arith.constant 0 : i32
    %c0_i32_0 = arith.constant 0 : i32
    %c0_i32_1 = arith.constant 0 : i32
    return %c0_i32, %c0_i32_0 : i32, i32
  }
  func.func @transform_3(%arg0: i32) -> (i32, i32) {
    %c0_i32 = arith.constant 0 : i32
    %c0_i32_0 = arith.constant 0 : i32
    %c0_i32_1 = arith.constant 0 : i32
    return %c0_i32, %c0_i32_0 : i32, i32
  }
  func.func @transform_4(%arg0: i32) -> (i32, i32) {
    %c0_i32 = arith.constant 0 : i32
    %c0_i32_0 = arith.constant 0 : i32
    %c0_i32_1 = arith.constant 0 : i32
    return %c0_i32, %c0_i32_0 : i32, i32
  }
  func.func @transform_5(%arg0: i32) -> (i32, i32) {
    %c0_i32 = arith.constant 0 : i32
    %c0_i32_0 = arith.constant 0 : i32
    %c0_i32_1 = arith.constant 0 : i32
    return %c0_i32, %c0_i32_0 : i32, i32
  }
  func.func @transform_6(%arg0: i32) -> i32 {
    %c0_i32 = arith.constant 0 : i32
    %c0_i32_0 = arith.constant 0 : i32
    return %c0_i32 : i32
  }
  func.func @transform_7(%arg0: i32) -> (i32, i32, i32) {
    %c0_i32 = arith.constant 0 : i32
    %c0_i32_0 = arith.constant 0 : i32
    %c0_i32_1 = arith.constant 0 : i32
    return %arg0, %c0_i32, %c0_i32_0 : i32, i32, i32
  }
}

</mosaic_0001>

<bundles_post_ra>
// kernel: tpu_custom_call.1
= control target key start
LH: loop header
LB: loop body
LE: loop exit
PB: predicated region body
PF: predicated region fallthrough
CT: control target
= control target key end

     0   :  { %s1225_s0 = inlined_call_operand.vmem [shape: f32[384,16], index: 0, kind: input, shape index: {}]   ;;  %s1226_s1 = inlined_call_operand.vmem [shape: f32[16,128], index: 1, kind: input, shape index: {}]   ;;  %s1227_s2 = inlined_call_operand.vmem [shape: f32[1,128], index: 2, kind: input, shape index: {}]   ;;  %s1228_s3 = inlined_call_operand.vmem [shape: f32[128,128], index: 3, kind: input, shape index: {}]   ;;  %s1229_s4 = inlined_call_operand.vmem [shape: f32[1,128], index: 4, kind: input, shape index: {}]   ;;  %s1230_s5 = inlined_call_operand.vmem [shape: f32[1,128], index: 5, kind: input, shape index: {}]   ;;  %s1231_s6 = inlined_call_operand.<no memory space> [shape: f32[1], index: 6, kind: input, shape index: {}]   ;;  %s1232_s7 = inlined_call_operand.hbm [shape: f32[3,1,128], index: 7, kind: output, shape index: {}]  }
   0x1   :  { %12 = sst [smem:[#allocation2]] %s1231_s6 }
   0x2   :  { %13 = vsyncpa [#allocation4], 0 }
   0x3   :  { %15 = vsyncpa [#allocation4 + $0x1], 0  ;;  %s958_s26 = smov 0   ;;  %s960_s27 = smov 0  }
   0x4   :  { %s962_s28 = smov 0   ;;  %s964_s29 = smov 0  }
   0x5 LB: > { %s979_s6 = sadd.s32 4294967295, %s913_s29   ;;  %s751_s30 = sadd.s32 4294967294, %s913_s29   ;;  %s913_s29 = sphi %s964_s29, %s1238_s29   ;;  %s909_s28 = sphi %s962_s28, %s1237_s28   ;;  %s905_s27 = sphi %s960_s27, %s1236_s27   ;;  %s901_s26 = sphi %s958_s26, %s1235_s26  }
   0x6   : > { %s983_s8 = sadd.s32 1, %s913_s29   ;;  %s180_s9 = sadd.s32 1, %s909_s28 }
   0x7   : > { %s177_s10 = ssub.s32 %s913_s29, %s983_s8  ;;  %p190_p0 = scmp.ne.s32.totalorder %s909_s28, %s905_s27 }
   0x8   : > { %p178_p1 = scmp.eq.s32.totalorder %s177_s10, 0  ;;  %p191_p2 = scmp.eq.s32.totalorder %s979_s6, 2 }
   0x9   : > { %p196_p3 = scmp.ne.s32.totalorder %s905_s27, %s901_s26  ;;  %p197_p4 = scmp.eq.s32.totalorder %s751_s30, 2 }
   0xa   : > { %s994_s11 = scalar_select %p178_p1, %s909_s28, %s180_s9  }
   0xb   : > { %p996_p5 = por %p191_p2, %p190_p0  ;;  %p1000_p6 = por %p197_p4, %p196_p3 }
   0xc   : > { %p754_p7 = scmp.ge.s32.totalorder %s913_s29, 1  ;;  %p242_p8 = scmp.lt.s32.totalorder %s913_s29, 4 }
   0xe   : > { %p243_p9 = pnand %p754_p7, %p242_p8 }
   0xf   : > { %s755_s18 = sshll.u32 (!%p243_p9), %s979_s6, 4  ;;  %s584_s17 = sld [smem:[#allocation2]] (!%p243_p9) }
  0x10   : > { %246 = sbr.rel (%p243_p9) target bundleno = 523 (0x20b), region = 48  ;;  %p274_p10 = scmp.lt.s32.totalorder (!%p243_p9), %s755_s18, 47 }
  0x11   : > { %s692_s21 = scalar_lea.hbm (!%p243_p9), %s1232_s7, %s979_s6  ;;  %s871_s14 = scalar_lea.hbm (!%p243_p9), %s1232_s7, 3 }
  0x12   : > { %s696_s6 = sshll.u32 (!%p243_p9), %s692_s21, 4  ;;  %s697_s6 = int_to_ptr.hbm [resolvable:$true] %s696_s6 }
  0x13   : > { %s865_s30 = sshra.s32 (!%p243_p9), %s697_s6, 4  ;;  %s866_s30 = int_to_ptr.hbm [resolvable:$true] %s865_s30 }
  0x14   : > { %p872_p0 = scmp.lt.s32.totalorder (!%p243_p9), %s866_s30, %s1232_s7 }
  0x15   : > { %v296_v0 = vld [vmem:[%s1226_s1 + $0x8] sm:$0xff]  ;;  %v295_v1 = vld [vmem:[%s1226_s1] sm:$0xff]  ;;  %s1240_s18 = smov (!%p274_p10, %s755_s18), 47  ;;  %vm301_vm0 = vcmask 130048   ;;  %v446_v11 = vld [vmem:[%s1228_s3 + $0x78] sm:$0xff]  ;;  %vm623_vm1 = vcmask 130112  }
  0x16   : > { %364 = vmatpush.msra.mxu0 %v296_v0  ;;  %775 = vmatpush.msra.mxu3 %v296_v0  ;;  %s756_s19 = sshll.u32 %s1240_s18, 3  ;;  %v445_v12 = vld [vmem:[%s1228_s3 + $0x70] sm:$0xff]  ;;  %v444_v13 = vld [vmem:[%s1228_s3 + $0x68] sm:$0xff]  ;;  %v443_v15 = vld [vmem:[%s1228_s3 + $0x60] sm:$0xff]  ;;  %vm627_vm2 = vcmask 195712   ;;  %vm631_vm3 = vcmask 261312  }
  0x17   : > { %s1016_s22 = scalar_lea.vmem %s1225_s0, %s756_s19  ;;  %451 = vmatpush.msra.mxu1 %v446_v11  ;;  %777 = vmatpush.msra.mxu2 %v446_v11  ;;  %v442_v17 = vld [vmem:[%s1228_s3 + $0x58] sm:$0xff]  ;;  %v441_v18 = vld [vmem:[%s1228_s3 + $0x50] sm:$0xff]  ;;  %v440_v19 = vld [vmem:[%s1228_s3 + $0x48] sm:$0xff]  ;;  %vm635_vm4 = vcmask 326912   ;;  %vm639_vm5 = vcmask 392512   ;;  %vm643_vm6 = vcmask 458112  }
  0x18   : > { %365 = vmatpush.msra.mxu0 %v295_v1  ;;  %776 = vmatpush.msra.mxu3 %v295_v1  ;;  %v279_v2 = vld [vmem:[%s1016_s22] sm:$0xff]  ;;  %v280_v3 = vld [vmem:[%s1016_s22 + $0x8] sm:$0xff]  ;;  %v281_v4 = vld [vmem:[%s1016_s22 + $0x10] sm:$0xff]  ;;  %vm647_vm7 = vcmask 523712   ;;  %vm651_vm8 = vcmask 589312   ;;  %vm655_vm9 = vcmask 654912  }
  0x19   : > { %757 = vmatmul.msk.f32.vlgmr.msra.gmra.mxu0 %vm301_vm0, %v279_v2  ;;  %v282_v5 = vld [vmem:[%s1016_s22 + $0x18] sm:$0xff]  ;;  %v289_v6 = vld [vmem:[%s1016_s22 + $0x50] sm:$0xff]  ;;  %v283_v7 = vld [vmem:[%s1016_s22 + $0x20] sm:$0xff]  ;;  %452 = vmatpush.msra.mxu1 %v445_v12  ;;  %s271_s18 = sand.u32 1, %s905_s27   ;;  %vm659_vm10 = vcmask 720512   ;;  %vm663_vm11 = vcmask 786112  }
  0x1a   : > { %767 = vmatmul.msk.f32.vlgmr.msra.gmra.mxu3 %vm301_vm0, %v289_v6  ;;  %v290_v8 = vld [vmem:[%s1016_s22 + $0x58] sm:$0xff]  ;;  %v284_v9 = vld [vmem:[%s1016_s22 + $0x28] sm:$0xff]  ;;  %v291_v10 = vld [vmem:[%s1016_s22 + $0x60] sm:$0xff]  ;;  %779 = vmatpush.msra.mxu2 %v445_v12  ;;  %vm667_vm12 = vcmask 851712   ;;  %vm671_vm13 = vcmask 917312   ;;  %vm675_vm14 = vcmask 982912  }
  0x1b   : > { %778 = vmatpush.msrb.mxu3 %v446_v11  ;;  %v285_v14 = vld [vmem:[%s1016_s22 + $0x30] sm:$0xff]  ;;  %v292_v16 = vld [vmem:[%s1016_s22 + $0x68] sm:$0xff]  ;;  %453 = vmatpush.msra.mxu1 %v444_v13  ;;  %v286_v20 = vld [vmem:[%s1016_s22 + $0x38] sm:$0xff]  ;;  %s272_s23 = scalar_lea.vmem [#allocation3], %s271_s18  ;;  %vm679_vm15 = vcmask 1048512   ;;  %s684_s25 = scalar_lea.sflag [#allocation4], %s271_s18 }
  0x1c   : > { %781 = vmatpush.msra.mxu2 %v444_v13  ;;  %v439_v21 = vld [vmem:[%s1228_s3 + $0x40] sm:$0xff]  ;;  %v293_v22 = vld [vmem:[%s1016_s22 + $0x70] sm:$0xff]  ;;  %v438_v23 = vld [vmem:[%s1228_s3 + $0x38] sm:$0xff]  ;;  %s694_s24 = sshll.u32 %s272_s23, 4  ;;  %s695_s24 = int_to_ptr.vmem [resolvable:$true] %s694_s24 }
  0x1d   : > { %780 = vmatpush.msrb.mxu3 %v445_v12  ;;  %454 = vmatpush.msra.mxu1 %v443_v15  ;;  %v437_v24 = vld [vmem:[%s1228_s3 + $0x30] sm:$0xff]  ;;  %v436_v25 = vld [vmem:[%s1228_s3 + $0x28] sm:$0xff]  ;;  %v287_v26 = vld [vmem:[%s1016_s22 + $0x40] sm:$0xff] }
  0x1e   : > { %783 = vmatpush.msra.mxu2 %v443_v15  ;;  %v435_v27 = vld [vmem:[%s1228_s3 + $0x20] sm:$0xff]  ;;  %v294_v28 = vld [vmem:[%s1016_s22 + $0x78] sm:$0xff]  ;;  %v288_v30 = vld [vmem:[%s1016_s22 + $0x48] sm:$0xff]  ;;  %s867_s22 = scalar_lea.hbm %s866_s30, 1 }
  0x1f   : > { %782 = vmatpush.msrb.mxu3 %v444_v13  ;;  %455 = vmatpush.msra.mxu1 %v442_v17  ;;  %v434_v29 = vld [vmem:[%s1228_s3 + $0x18] sm:$0xff]  ;;  %v433_v31 = vld [vmem:[%s1228_s3 + $0x10] sm:$0xff]  ;;  %v432_v32 = vld [vmem:[%s1228_s3 + $0x8] sm:$0xff]  ;;  %p868_p11 = scmp.ne.s32.totalorder %s866_s30, %s867_s22  ;;  %p873_p1 = scmp.lt.s32.totalorder %s871_s14, %s867_s22 }
  0x20   : > { %785 = vmatpush.msra.mxu2 %v442_v17  ;;  %v431_v33 = vld [vmem:[%s1228_s3] sm:$0xff] }
  0x21   : > { %758 = vmatmul.msk.f32.gmra.mxu0 %vm301_vm0, %v280_v3  ;;  %784 = vmatpush.msrb.mxu3 %v443_v15  ;;  %v848_v34 = vld [vmem:[%s1227_s2] ss:$0 sm:$0xff]  ;;  %p869_p12 = pnand %p868_p11, %p996_p5  ;;  %p874_p2 = por %p873_p1, %p872_p0 }
  0x22   : > { %768 = vmatmul.msk.f32.gmra.mxu3 %vm301_vm0, %v290_v8  ;;  %456 = vmatpush.msra.mxu1 %v441_v18 }
  0x23   : > { %786 = vmatpush.msrb.mxu3 %v442_v17  ;;  %787 = vmatpush.msra.mxu2 %v441_v18  ;;  %p870_p13 = pneg %p869_p12 }
  0x24   : > { %457 = vmatpush.msra.mxu1 %v440_v19 }
  0x25   : > { %788 = vmatpush.msrb.mxu3 %v441_v18  ;;  %789 = vmatpush.msra.mxu2 %v440_v19  ;;  %p875_p3 = pnand %p874_p2, %p870_p13 }
  0x26   : > { %458 = vmatpush.msra.mxu1 %v439_v21 }
  0x27   : > { %791 = vmatpush.msra.mxu2 %v439_v21  ;;  %790 = vmatpush.msrb.mxu3 %v440_v19  ;;  %v1104_v19 = vld [vmem:[%s1229_s4] ss:$0 sm:$0xff] }
  0x28   : > { %459 = vmatpush.msra.mxu1 %v438_v23 }
  0x29   : > { %759 = vmatmul.msk.f32.gmra.mxu0 %vm301_vm0, %v281_v4  ;;  %793 = vmatpush.msra.mxu2 %v438_v23 }
  0x2a   : > { %769 = vmatmul.msk.f32.gmra.mxu3 %vm301_vm0, %v291_v10  ;;  %460 = vmatpush.msra.mxu1 %v437_v24 }
  0x2b   : > { %792 = vmatpush.msrb.mxu3 %v439_v21  ;;  %795 = vmatpush.msra.mxu2 %v437_v24 }
  0x2c   : > { %461 = vmatpush.msra.mxu1 %v436_v25 }
  0x2d   : > { %794 = vmatpush.msrb.mxu3 %v438_v23  ;;  %797 = vmatpush.msra.mxu2 %v436_v25 }
  0x2e   : > { %462 = vmatpush.msra.mxu1 %v435_v27 }
  0x2f   : > { %799 = vmatpush.msra.mxu2 %v435_v27  ;;  %796 = vmatpush.msrb.mxu3 %v437_v24 }
  0x30   : > { %463 = vmatpush.msra.mxu1 %v434_v29 }
  0x31   : > { %760 = vmatmul.msk.f32.gmra.mxu0 %vm301_vm0, %v282_v5  ;;  %801 = vmatpush.msra.mxu2 %v434_v29 }
  0x32   : > { %770 = vmatmul.msk.f32.gmra.mxu3 %vm301_vm0, %v292_v16  ;;  %464 = vmatpush.msra.mxu1 %v433_v31 }
  0x33   : > { %798 = vmatpush.msrb.mxu3 %v436_v25  ;;  %803 = vmatpush.msra.mxu2 %v433_v31 }
  0x34   : > { %465 = vmatpush.msra.mxu1 %v432_v32 }
  0x35   : > { %800 = vmatpush.msrb.mxu3 %v435_v27  ;;  %805 = vmatpush.msra.mxu2 %v432_v32 }
  0x36   : > { %466 = vmatpush.msra.mxu1 %v431_v33 }
  0x37   : > { %802 = vmatpush.msrb.mxu3 %v434_v29  ;;  %807 = vmatpush.msra.mxu2 %v431_v33 }
  0x39   : > { %761 = vmatmul.msk.f32.gmra.mxu0 %vm301_vm0, %v283_v7  ;;  %804 = vmatpush.msrb.mxu3 %v433_v31 }
  0x3a   : > { %771 = vmatmul.msk.f32.gmra.mxu3 %vm301_vm0, %v293_v22  ;;  %v1110_v22 = vld [vmem:[%s1230_s5] ss:$0 sm:$0xff] }
  0x3b   : > { %806 = vmatpush.msrb.mxu3 %v432_v32 }
  0x3d   : > { %808 = vmatpush.msrb.mxu3 %v431_v33 }
  0x41   : > { %762 = vmatmul.msk.f32.gmra.mxu0 %vm301_vm0, %v284_v9 }
  0x42   : > { %772 = vmatmul.msk.f32.gmra.mxu3 %vm301_vm0, %v294_v28 }
  0x49   : > { %763 = vmatmul.msk.f32.gmra.mxu0 %vm301_vm0, %v285_v14 }
  0x51   : > { %764 = vmatmul.msk.f32.gmra.mxu0 %vm301_vm0, %v286_v20 }
  0x59   : > { %765 = vmatmul.msk.f32.gmra.mxu0 %vm301_vm0, %v287_v26 }
  0x61   : > { %766 = vmatmul.msk.f32.gmra.mxu0 %vm301_vm0, %v288_v30 }
  0x96   : > { %v367_v35 = vpop.f32.mrf.mxu0 }
  0x97   : > { %v368_v36 = vadd.f32 %v848_v34, %v367_v35 }
  0x99   : > { %v415_v37 = vmax.f32 %v368_v36, 0.0 }
  0x9b   : > { %467 = vmatmul.f32.vlgmr.msra.gmra.mxu1 %v415_v37 }
  0x9d   : > { %v397_v49 = vpop.f32.mrf.mxu3 }
  0x9e   : > { %v370_v38 = vpop.f32.mrf.mxu0  ;;  %v398_v11 = vadd.f32 %v848_v34, %v397_v49 }
  0x9f   : > { %v371_v39 = vadd.f32 %v848_v34, %v370_v38 }
  0xa0   : > { %v425_v12 = vmax.f32 %v398_v11, 0.0 }
  0xa1   : > { %v416_v40 = vmax.f32 %v371_v39, 0.0 }
  0xa3   : > { %470 = vmatmul.f32.gmra.mxu1 %v416_v40 }
  0xa5   : > { %v400_v53 = vpop.f32.mrf.mxu3 }
  0xa6   : > { %v373_v41 = vpop.f32.mrf.mxu0  ;;  %v401_v13 = vadd.f32 %v848_v34, %v400_v53 }
  0xa7   : > { %v374_v42 = vadd.f32 %v848_v34, %v373_v41 }
  0xa8   : > { %v426_v14 = vmax.f32 %v401_v13, 0.0 }
  0xa9   : > { %v417_v43 = vmax.f32 %v374_v42, 0.0 }
  0xab   : > { %473 = vmatmul.f32.gmra.mxu1 %v417_v43 }
  0xad   : > { %v403_v57 = vpop.f32.mrf.mxu3 }
  0xae   : > { %v376_v44 = vpop.f32.mrf.mxu0  ;;  %v404_v15 = vadd.f32 %v848_v34, %v403_v57 }
  0xaf   : > { %v377_v45 = vadd.f32 %v848_v34, %v376_v44 }
  0xb0   : > { %v427_v16 = vmax.f32 %v404_v15, 0.0 }
  0xb1   : > { %v418_v46 = vmax.f32 %v377_v45, 0.0 }
  0xb3   : > { %476 = vmatmul.f32.gmra.mxu1 %v418_v46 }
  0xb5   : > { %v406_v61 = vpop.f32.mrf.mxu3 }
  0xb6   : > { %v379_v47 = vpop.f32.mrf.mxu0  ;;  %v407_v17 = vadd.f32 %v848_v34, %v406_v61 }
  0xb7   : > { %v380_v48 = vadd.f32 %v848_v34, %v379_v47 }
  0xb8   : > { %v428_v18 = vmax.f32 %v407_v17, 0.0 }
  0xb9   : > { %v419_v50 = vmax.f32 %v380_v48, 0.0 }
  0xbb   : > { %479 = vmatmul.f32.gmra.mxu1 %v419_v50 }
  0xbd   : > { %v409_v1 = vpop.f32.mrf.mxu3 }
  0xbe   : > { %v382_v51 = vpop.f32.mrf.mxu0  ;;  %v410_v3 = vadd.f32 %v848_v34, %v409_v1 }
  0xbf   : > { %v383_v52 = vadd.f32 %v848_v34, %v382_v51 }
  0xc0   : > { %v429_v4 = vmax.f32 %v410_v3, 0.0 }
  0xc1   : > { %v420_v54 = vmax.f32 %v383_v52, 0.0 }
  0xc2   : > { %509 = vmatmul.f32.vlgmr.msrb.gmra.mxu3 %v429_v4 }
  0xc3   : > { %482 = vmatmul.f32.gmra.mxu1 %v420_v54 }
  0xc5   : > { %v412_v7 = vpop.f32.mrf.mxu3 }
  0xc6   : > { %v385_v55 = vpop.f32.mrf.mxu0  ;;  %v413_v9 = vadd.f32 %v848_v34, %v412_v7 }
  0xc7   : > { %v386_v56 = vadd.f32 %v848_v34, %v385_v55 }
  0xc8   : > { %v430_v10 = vmax.f32 %v413_v9, 0.0 }
  0xc9   : > { %v421_v58 = vmax.f32 %v386_v56, 0.0 }
  0xca   : > { %512 = vmatmul.f32.gmra.mxu3 %v430_v10 }
  0xcb   : > { %485 = vmatmul.f32.gmra.mxu1 %v421_v58 }
  0xce   : > { %v388_v59 = vpop.f32.mrf.mxu0 }
  0xcf   : > { %v389_v60 = vadd.f32 %v848_v34, %v388_v59 }
  0xd1   : > { %v422_v62 = vmax.f32 %v389_v60, 0.0 }
  0xd3   : > { %488 = vmatmul.f32.vlgmr.msra.gmra.mxu2 %v422_v62 }
  0xd6   : > { %v391_v63 = vpop.f32.mrf.mxu0 }
  0xd7   : > { %v392_v0 = vadd.f32 %v848_v34, %v391_v63 }
  0xd9   : > { %v423_v2 = vmax.f32 %v392_v0, 0.0 }
  0xdb   : > { %491 = vmatmul.f32.gmra.mxu2 %v423_v2 }
  0xde   : > { %v394_v5 = vpop.f32.mrf.mxu0 }
  0xdf   : > { %v395_v6 = vadd.f32 %v848_v34, %v394_v5 }
  0xe1   : > { %v424_v8 = vmax.f32 %v395_v6, 0.0 }
  0xe3   : > { %494 = vmatmul.f32.gmra.mxu2 %v424_v8 }
  0xeb   : > { %497 = vmatmul.f32.gmra.mxu2 %v425_v12 }
  0xf3   : > { %500 = vmatmul.f32.gmra.mxu2 %v426_v14 }
  0xfb   : > { %503 = vmatmul.f32.gmra.mxu2 %v427_v16 }
 0x103   : > { %506 = vmatmul.f32.gmra.mxu2 %v428_v18 }
 0x118   : > { %v468_v20 = vpop.f32.mrf.mxu1 }
 0x119   : > { %v469_v21 = vadd.f32 %v1104_v19, %v468_v20 }
 0x11b   : > { %v516_v23 = vmax.f32 %v469_v21, 0.0 }
 0x11d   : > { %v536_v24 = vmul.f32 %v1110_v22, %v516_v23 }
 0x11f   : > { %552 = vadd.xlane.f32.xlu0 %v536_v24 }
 0x120   : > { %v471_v25 = vpop.f32.mrf.mxu1 }
 0x121   : > { %v472_v26 = vadd.f32 %v1104_v19, %v471_v25 }
 0x123   : > { %v517_v27 = vmax.f32 %v472_v26, 0.0 }
 0x125   : > { %v537_v28 = vmul.f32 %v1110_v22, %v517_v27 }
 0x127   : > { %554 = vadd.xlane.f32.xlu0 %v537_v28 }
 0x128   : > { %v474_v29 = vpop.f32.mrf.mxu1 }
 0x129   : > { %v475_v30 = vadd.f32 %v1104_v19, %v474_v29 }
 0x12b   : > { %v518_v31 = vmax.f32 %v475_v30, 0.0  ;;  %v618_v30 = vlaneseq }
 0x12d   : > { %v538_v32 = vmul.f32 %v1110_v22, %v518_v31  ;;  %v1143_v31 = vand.u32 127, %v618_v30 }
 0x12f   : > { %556 = vadd.xlane.f32.xlu1 %v538_v32 }
 0x130   : > { %v477_v33 = vpop.f32.mrf.mxu1 }
 0x131   : > { %v478_v34 = vadd.f32 %v1104_v19, %v477_v33  ;;  %v621_v33 = vadd.s32 4294967288, %v1143_v31 }
 0x133   : > { %v519_v35 = vmax.f32 %v478_v34, 0.0 }
 0x135   : > { %v539_v36 = vmul.f32 %v1110_v22, %v519_v35 }
 0x137   : > { %558 = vadd.xlane.f32.xlu1 %v539_v36 }
 0x138   : > { %v480_v37 = vpop.f32.mrf.mxu1 }
 0x139   : > { %v481_v38 = vadd.f32 %v1104_v19, %v480_v37  ;;  %v625_v37 = vadd.s32 4294967280, %v1143_v31 }
 0x13b   : > { %v520_v39 = vmax.f32 %v481_v38, 0.0 }
 0x13d   : > { %v540_v40 = vmul.f32 %v1110_v22, %v520_v39 }
 0x13f   : > { %560 = vadd.xlane.f32.xlu2 %v540_v40  ;;  %v629_v40 = vadd.s32 4294967272, %v1143_v31 }
 0x140   : > { %v483_v41 = vpop.f32.mrf.mxu1 }
 0x141   : > { %v484_v42 = vadd.f32 %v1104_v19, %v483_v41 }
 0x143   : > { %v521_v43 = vmax.f32 %v484_v42, 0.0  ;;  %v633_v42 = vadd.s32 4294967264, %v1143_v31 }
 0x145   : > { %v541_v44 = vmul.f32 %v1110_v22, %v521_v43  ;;  %v510_v1 = vpop.f32.mrf.mxu3 }
 0x146   : > { %v511_v5 = vadd.f32 %v1104_v19, %v510_v1  ;;  %v657_v1 = vadd.s32 4294967216, %v1143_v31 }
 0x147   : > { %562 = vadd.xlane.f32.xlu2 %v541_v44 }
 0x148   : > { %v486_v45 = vpop.f32.mrf.mxu1  ;;  %v530_v7 = vmax.f32 %v511_v5, 0.0  ;;  %v661_v5 = vadd.s32 4294967208, %v1143_v31 }
 0x149   : > { %v487_v46 = vadd.f32 %v1104_v19, %v486_v45 }
 0x14a   : > { %v550_v12 = vmul.f32 %v1110_v22, %v530_v7 }
 0x14b   : > { %v522_v47 = vmax.f32 %v487_v46, 0.0  ;;  %v637_v46 = vadd.s32 4294967256, %v1143_v31 }
 0x14d   : > { %v542_v48 = vmul.f32 %v1110_v22, %v522_v47  ;;  %v513_v9 = vpop.f32.mrf.mxu3 }
 0x14e   : > { %v514_v13 = vadd.f32 %v1104_v19, %v513_v9  ;;  %v665_v9 = vadd.s32 4294967200, %v1143_v31 }
 0x14f   : > { %564 = vadd.xlane.f32.xlu0 %v542_v48 }
 0x150   : > { %v531_v15 = vmax.f32 %v514_v13, 0.0 }
 0x152   : > { %v551_v20 = vmul.f32 %v1110_v22, %v531_v15 }
 0x156   : > { %v489_v49 = vpop.f32.mrf.mxu2 }
 0x157   : > { %v490_v50 = vadd.f32 %v1104_v19, %v489_v49  ;;  %v641_v49 = vadd.s32 4294967248, %v1143_v31 }
 0x159   : > { %v523_v51 = vmax.f32 %v490_v50, 0.0 }
 0x15b   : > { %v543_v52 = vmul.f32 %v1110_v22, %v523_v51 }
 0x15d   : > { %566 = vadd.xlane.f32.xlu1 %v543_v52 }
 0x15e   : > { %v492_v53 = vpop.f32.mrf.mxu2 }
 0x15f   : > { %v493_v54 = vadd.f32 %v1104_v19, %v492_v53  ;;  %v645_v53 = vadd.s32 4294967240, %v1143_v31 }
 0x161   : > { %v524_v55 = vmax.f32 %v493_v54, 0.0 }
 0x163   : > { %v544_v56 = vmul.f32 %v1110_v22, %v524_v55 }
 0x165   : > { %568 = vadd.xlane.f32.xlu2 %v544_v56 }
 0x166   : > { %v495_v57 = vpop.f32.mrf.mxu2 }
 0x167   : > { %v496_v58 = vadd.f32 %v1104_v19, %v495_v57  ;;  %v649_v57 = vadd.s32 4294967232, %v1143_v31 }
 0x169   : > { %v525_v59 = vmax.f32 %v496_v58, 0.0 }
 0x16b   : > { %v545_v60 = vmul.f32 %v1110_v22, %v525_v59 }
 0x16d   : > { %570 = vadd.xlane.f32.xlu0 %v545_v60 }
 0x16e   : > { %v498_v61 = vpop.f32.mrf.mxu2 }
 0x16f   : > { %v499_v62 = vadd.f32 %v1104_v19, %v498_v61 }
 0x171   : > { %v526_v63 = vmax.f32 %v499_v62, 0.0  ;;  %v653_v62 = vadd.s32 4294967224, %v1143_v31 }
 0x173   : > { %v546_v0 = vmul.f32 %v1110_v22, %v526_v63 }
 0x175   : > { %572 = vadd.xlane.f32.xlu1 %v546_v0 }
 0x176   : > { %v501_v2 = vpop.f32.mrf.mxu2 }
 0x177   : > { %v502_v3 = vadd.f32 %v1104_v19, %v501_v2 }
 0x179   : > { %v527_v4 = vmax.f32 %v502_v3, 0.0 }
 0x17b   : > { %v547_v6 = vmul.f32 %v1110_v22, %v527_v4 }
 0x17d   : > { %574 = vadd.xlane.f32.xlu2 %v547_v6 }
 0x17e   : > { %v504_v8 = vpop.f32.mrf.mxu2 }
 0x17f   : > { %v505_v10 = vadd.f32 %v1104_v19, %v504_v8 }
 0x181   : > { %v528_v11 = vmax.f32 %v505_v10, 0.0 }
 0x183   : > { %v548_v14 = vmul.f32 %v1110_v22, %v528_v11 }
 0x185   : > { %576 = vadd.xlane.f32.xlu0 %v548_v14  ;;  %580 = vadd.xlane.f32.xlu2 %v550_v12 }
 0x186   : > { %v507_v16 = vpop.f32.mrf.mxu2 }
 0x187   : > { %v508_v17 = vadd.f32 %v1104_v19, %v507_v16  ;;  %v1145_v19 = vstv %s584_s17 }
 0x189   : > { %v529_v18 = vmax.f32 %v508_v17, 0.0 }
 0x18b   : > { %v549_v21 = vmul.f32 %v1110_v22, %v529_v18  ;;  %v669_v18 = vadd.s32 4294967192, %v1143_v31 }
 0x18d   : > { %578 = vadd.xlane.f32.xlu1 %v549_v21  ;;  %582 = vadd.xlane.f32.xlu0 %v551_v20  ;;  %v677_v20 = vadd.s32 4294967176, %v1143_v31 }
 0x192   : > { %v553_v23 = vpop.xlane.xlu0 %552 }
 0x193   : > { %v586_v36 = vadd.f32 %v1145_v19, %v553_v23 }
 0x195   : > { %v620_v44 = vperm.slane %v586_v36, %v1143_v31 }
 0x19a   : > { %v555_v26 = vpop.xlane.xlu0 %554 }
 0x19b   : > { %v587_v22 = vadd.f32 %v1145_v19, %v555_v26 }
 0x19d   : > { %v622_v39 = vperm.slane %v587_v22, %v621_v33 }
 0x19f   : > { %v624_v51 = vsel %vm623_vm1, %v622_v39, %v620_v44 }
 0x1a2   : > { %v557_v25 = vpop.xlane.xlu1 %556 }
 0x1a3   : > { %v588_v38 = vadd.f32 %v1145_v19, %v557_v25 }
 0x1a5   : > { %v626_v45 = vperm.slane %v588_v38, %v625_v37 }
 0x1a7   : > { %v628_v60 = vsel %vm627_vm2, %v626_v45, %v624_v51 }
 0x1aa   : > { %v559_v28 = vpop.xlane.xlu1 %558 }
 0x1ab   : > { %v589_v41 = vadd.f32 %v1145_v19, %v559_v28 }
 0x1ad   : > { %v630_v52 = vperm.slane %v589_v41, %v629_v40 }
 0x1af   : > { %v632_v3 = vsel %vm631_vm3, %v630_v52, %v628_v60 }
 0x1b2   : > { %v561_v24 = vpop.xlane.xlu2 %560 }
 0x1b3   : > { %v590_v43 = vadd.f32 %v1145_v19, %v561_v24  ;;  %v673_v24 = vadd.s32 4294967184, %v1143_v31 }
 0x1b5   : > { %v634_v56 = vperm.slane %v590_v43, %v633_v42 }
 0x1b7   : > { %v636_v7 = vsel %vm635_vm4, %v634_v56, %v632_v3 }
 0x1ba   : > { %v563_v27 = vpop.xlane.xlu2 %562 }
 0x1bb   : > { %v591_v47 = vadd.f32 %v1145_v19, %v563_v27 }
 0x1bd   : > { %v638_v61 = vperm.slane %v591_v47, %v637_v46 }
 0x1bf   : > { %v640_v11 = vsel %vm639_vm5, %v638_v61, %v636_v7 }
 0x1c2   : > { %v565_v29 = vpop.xlane.xlu0 %564 }
 0x1c3   : > { %v592_v50 = vadd.f32 %v1145_v19, %v565_v29 }
 0x1c5   : > { %v642_v0 = vperm.slane %v592_v50, %v641_v49 }
 0x1c7   : > { %v644_v14 = vsel %vm643_vm6, %v642_v0, %v640_v11 }
 0x1d0   : > { %v567_v34 = vpop.xlane.xlu1 %566 }
 0x1d1   : > { %v593_v54 = vadd.f32 %v1145_v19, %v567_v34 }
 0x1d3   : > { %v646_v4 = vperm.slane %v593_v54, %v645_v53 }
 0x1d5   : > { %v648_v16 = vsel %vm647_vm7, %v646_v4, %v644_v14 }
 0x1d8   : > { %v569_v32 = vpop.xlane.xlu2 %568 }
 0x1d9   : > { %v594_v58 = vadd.f32 %v1145_v19, %v569_v32 }
 0x1db   : > { %v650_v8 = vperm.slane %v594_v58, %v649_v57 }
 0x1dd   : > { %v652_v21 = vsel %vm651_vm8, %v650_v8, %v648_v16 }
 0x1e0   : > { %v571_v35 = vpop.xlane.xlu0 %570 }
 0x1e1   : > { %v595_v63 = vadd.f32 %v1145_v19, %v571_v35 }
 0x1e3   : > { %v654_v12 = vperm.slane %v595_v63, %v653_v62 }
 0x1e5   : > { %v656_v28 = vsel %vm655_vm9, %v654_v12, %v652_v21 }
 0x1e8   : > { %v573_v55 = vpop.xlane.xlu1 %572 }
 0x1e9   : > { %v596_v2 = vadd.f32 %v1145_v19, %v573_v55 }
 0x1eb   : > { %v658_v15 = vperm.slane %v596_v2, %v657_v1 }
 0x1ed   : > { %v660_v32 = vsel %vm659_vm10, %v658_v15, %v656_v28 }
 0x1f0   : > { %v575_v48 = vpop.xlane.xlu2 %574 }
 0x1f1   : > { %v597_v6 = vadd.f32 %v1145_v19, %v575_v48 }
 0x1f3   : > { %v662_v17 = vperm.slane %v597_v6, %v661_v5 }
 0x1f5   : > { %v664_v31 = vsel %vm663_vm11, %v662_v17, %v660_v32 }
 0x1f8   : > { %v577_v59 = vpop.xlane.xlu0 %576  ;;  %v581_v13 = vpop.xlane.xlu2 %580 }
 0x1f9   : > { %v598_v10 = vadd.f32 %v1145_v19, %v577_v59  ;;  %v600_v25 = vadd.f32 %v1145_v19, %v581_v13 }
 0x1fb   : > { %v666_v23 = vperm.slane %v598_v10, %v665_v9  ;;  %v674_v35 = vperm.slane %v600_v25, %v673_v24 }
 0x1fd   : > { %v668_v34 = vsel %vm667_vm12, %v666_v23, %v664_v31 }
 0x200   : > { %v579_v26 = vpop.xlane.xlu1 %578  ;;  %v583_v27 = vpop.xlane.xlu0 %582 }
 0x201   : > { %v599_v29 = vadd.f32 %v1145_v19, %v579_v26  ;;  %v601_v30 = vadd.f32 %v1145_v19, %v583_v27 }
 0x203   : > { %v670_v33 = vperm.slane %v599_v29, %v669_v18  ;;  %v678_v22 = vperm.slane %v601_v30, %v677_v20 }
 0x205   : > { %v672_v36 = vsel %vm671_vm13, %v670_v33, %v668_v34 }
 0x206   : > { %v676_v37 = vsel %vm675_vm14, %v674_v35, %v672_v36 }
 0x207   : > { %v680_v19 = vsel %vm679_vm15, %v678_v22, %v676_v37 }
 0x208   : > { %682 = vst [vmem:[%s272_s23] sm:$0x1] %v680_v19 }
 0x209   : > { %878 = shalt.err (!%p875_p3)
}
 0x20a   : > { %809 = dma.vmem_to_hbm [thread:$0]  (%p996_p5), %s695_s24, 16, %s697_s6, %s684_s25  }
 0x20b PF: > { %p815_p4 = scmp.ge.s32.totalorder %s913_s29, 2  ;;  %s708_s17 = sand.u32 1, %s901_s26  }
 0x20c   : > { %s709_s18 = scalar_lea.sflag [#allocation4], %s708_s17 }
 0x20d   : > { %p812_p7 = pnand %p815_p4, %p1000_p6 }
 0x20f   : > { %p813_p8 = pneg %p812_p7 }
 0x211   : > { %896 = dma.done.wait (%p813_p8), %s709_s18, 16  }
 0x212   : > { %898 = vsyncadd (%p813_p8), %s709_s18, 4294967280  ;;  %p18_p9 = scmp.ge.s32.totalorder %s983_s8, 5   ;;  %s1235_s26 = smov %s905_s27 }
 0x213   : > { %s1236_s27 = smov %s909_s28  ;;  %s1237_s28 = smov %s994_s11 }
 0x214   : > { %s1238_s29 = smov %s983_s8  ;;  %20 = sbr.rel (!%p18_p9) target bundleno = 5 (0x5), region = 83 }
 0x219   :  { %714 = vsyncpa [#allocation4], 1 }
 0x21a   :  { %716 = vsyncpa [#allocation4 + $0x1], 1 }

</bundles_post_ra>
